<compile_context>
chip_gen: v6e
topology: v6e:2x2x1
jax: 0.10.0
libtpu: 0.0.40
codegen_flags: <defaults>
</compile_context>

<pallas_src>
import jax
import jax.numpy as jnp
from jax.experimental import pallas as pl
from jax.experimental.pallas import tpu as pltpu

BN_EPS = 1e-5


# ---------------------------------------------------------------------------
# Pallas kernel: fused (im2col-matmul + BN-folded bias + ReLU)
# ---------------------------------------------------------------------------
def _matmul_bias_relu_kernel(cols_ref, w_ref, b_ref, o_ref):
    """out = relu(W @ cols + b); one MXU dot per (batch, spatial-tile) grid cell.

    cols_ref: (1, KKC, TM)  im2col columns (lane-dense flattened spatial dim)
    w_ref:    (Cout, KKC)   BN-folded weights
    b_ref:    (Cout, 1)     BN-folded bias
    o_ref:    (1, Cout, TM) lane-dense output tile
    """
    acc = jnp.dot(w_ref[...], cols_ref[0],
                  preferred_element_type=jnp.float32)          # MXU, (Cout, TM)
    o_ref[0] = jnp.maximum(acc + b_ref[...], 0.0).astype(o_ref.dtype)


def _pick_spatial_tile(m, kkc, budget_bytes=8 * 1024 * 1024):
    """Largest multiple-of-128 divisor of m whose double-buffered cols block
    stays well under the smallest per-generation VMEM budget."""
    if m % 128 != 0:
        return m  # fall back to the full (untiled) spatial dim
    best, t = 128, 128
    while t <= m:
        if m % t == 0 and 2 * 4 * kkc * t <= budget_bytes:
            best = t
        t += 128
    return best


def matmul_bias_relu(cols, w2d, bias):
    """cols: (N, KKC, M), w2d: (Cout, KKC), bias: (Cout,) -> (N, Cout, M)."""
    n, kkc, m = cols.shape
    cout = w2d.shape[0]
    tm = _pick_spatial_tile(m, kkc)
    grid = (n, m // tm)
    bias2 = bias.reshape(cout, 1).astype(jnp.float32)
    return pl.pallas_call(
        _matmul_bias_relu_kernel,
        out_shape=jax.ShapeDtypeStruct((n, cout, m), jnp.float32),
        grid_spec=pltpu.PrefetchScalarGridSpec(
            num_scalar_prefetch=0,
            grid=grid,
            in_specs=[
                pl.BlockSpec((1, kkc, tm), lambda i, j: (i, 0, j)),
                pl.BlockSpec((cout, kkc), lambda i, j: (0, 0)),
                pl.BlockSpec((cout, 1), lambda i, j: (0, 0)),
            ],
            out_specs=pl.BlockSpec((1, cout, tm), lambda i, j: (i, 0, j)),
        ),
        compiler_params=pltpu.CompilerParams(
            dimension_semantics=("parallel", "parallel")),
    )(cols.astype(jnp.float32), w2d.astype(jnp.float32), bias2)


# ---------------------------------------------------------------------------
# Wrapper-side layout plumbing (zero FLOPs)
# ---------------------------------------------------------------------------
def _im2col(x_pad, k, stride, ho, wo):
    """(N, C, Hp, Wp) padded NCHW -> (N, K*K*C, Ho*Wo), tap-major (kh, kw, cin)."""
    n, c, _, _ = x_pad.shape
    taps = []
    for kh in range(k):
        for kw in range(k):
            win = jax.lax.slice(
                x_pad,
                (0, 0, kh, kw),
                (n, c, kh + stride * (ho - 1) + 1, kw + stride * (wo - 1) + 1),
                (1, 1, stride, stride))                 # (N, C, Ho, Wo)
            taps.append(win)
    cols = jnp.stack(taps, axis=1)                      # (N, K*K, C, Ho, Wo)
    return cols.reshape(n, k * k * c, ho * wo)


def _fold_bn(w_oihw, b, gamma, beta, mean, var):
    """Fold eval-mode BatchNorm2d into conv weights/bias (per output channel)."""
    s = gamma / jnp.sqrt(var + BN_EPS)
    return w_oihw * s[:, None, None, None], (b - mean) * s + beta


# ---------------------------------------------------------------------------
# ConvBatchNormBlock forward (NCHW in, NCHW out — matches PyTorch)
# ---------------------------------------------------------------------------
def conv_batchnorm_block(x, params, *, kernel_size, stride=1, padding=0,
                         upsample=False):
    n, c, h, w_in = x.shape
    k = kernel_size
    w, b = params["conv_w"], params["conv_b"]
    gamma, beta = params["bn_gamma"], params["bn_beta"]
    mean, var = params["bn_mean"], params["bn_var"]

    if not upsample:
        # Conv2d(C, C, k, stride, padding)
        w_f, b_f = _fold_bn(w, b, gamma, beta, mean, var)        # OIHW
        cout = w_f.shape[0]
        ho = (h + 2 * padding - k) // stride + 1
        wo = (w_in + 2 * padding - k) // stride + 1
        x_pad = jnp.pad(x, ((0, 0), (0, 0), (padding, padding), (padding, padding)))
        cols = _im2col(x_pad, k, stride, ho, wo)
    else:
        # ConvTranspose2d(C, C, k, stride, padding, output_padding=1) as a
        # stride-1 conv over the zero-dilated / asymmetrically padded input with
        # the spatially-flipped, in/out-swapped kernel.
        # TODO(synk): polyphase decomposition would skip the zero MACs.
        out_pad = 1
        w_conv = jnp.transpose(jnp.flip(w, axis=(2, 3)), (1, 0, 2, 3))  # IOHW->OIHW
        w_f, b_f = _fold_bn(w_conv, b, gamma, beta, mean, var)
        cout = w_f.shape[0]
        ho = (h - 1) * stride - 2 * padding + k + out_pad
        wo = (w_in - 1) * stride - 2 * padding + k + out_pad
        hd, wd = (h - 1) * stride + 1, (w_in - 1) * stride + 1
        x_dil = jnp.zeros((n, c, hd, wd), x.dtype).at[:, :, ::stride, ::stride].set(x)
        lo, hi = k - 1 - padding, k - 1 - padding + out_pad
        x_pad = jnp.pad(x_dil, ((0, 0), (0, 0), (lo, hi), (lo, hi)))
        cols = _im2col(x_pad, k, 1, ho, wo)

    # Weights reshaped with the same tap-major (kh, kw, cin) ordering as _im2col.
    w2d = jnp.transpose(w_f, (0, 2, 3, 1)).reshape(cout, k * k * c)
    out_flat = matmul_bias_relu(cols, w2d, b_f)                  # (N, Cout, Ho*Wo)
    return out_flat.reshape(n, cout, ho, wo)


# ---------------------------------------------------------------------------
# Pure-JAX reference (XLA conv) with identical PyTorch semantics
# ---------------------------------------------------------------------------
def conv_batchnorm_block_ref(x, params, *, kernel_size, stride=1, padding=0,
                             upsample=False):
    w, b = params["conv_w"], params["conv_b"]
    gamma, beta = params["bn_gamma"], params["bn_beta"]
    mean, var = params["bn_mean"], params["bn_var"]
    k = kernel_size
    if not upsample:
        y = jax.lax.conv_general_dilated(
            x, w, window_strides=(stride, stride),
            padding=[(padding, padding)] * 2,
            dimension_numbers=("NCHW", "OIHW", "NCHW"))
    else:
        out_pad = 1
        w_conv = jnp.transpose(jnp.flip(w, axis=(2, 3)), (1, 0, 2, 3))
        lo, hi = k - 1 - padding, k - 1 - padding + out_pad
        y = jax.lax.conv_general_dilated(
            x, w_conv, window_strides=(1, 1), padding=[(lo, hi)] * 2,
            lhs_dilation=(stride, stride),
            dimension_numbers=("NCHW", "OIHW", "NCHW"))
    y = y + b[None, :, None, None]
    y = (y - mean[None, :, None, None]) * (
        gamma[None, :, None, None] / jnp.sqrt(var[None, :, None, None] + BN_EPS)
    ) + beta[None, :, None, None]
    return jnp.maximum(y, 0.0)


# ---------------------------------------------------------------------------
if __name__ == "__main__":
    key = jax.random.PRNGKey(0)
    N, C, H, W = 2, 4, 16, 16                       # NCHW, matches PyTorch
    keys = jax.random.split(key, 13)
    x = jax.random.normal(keys[0], (N, C, H, W), jnp.float32)

    def make_params(ks, k):
        kw, kb, kg, kbe, km, kv = ks
        return {
            "conv_w": 0.1 * jax.random.normal(kw, (C, C, k, k), jnp.float32),
            "conv_b": 0.1 * jax.random.normal(kb, (C,), jnp.float32),
            "bn_gamma": 1.0 + 0.1 * jax.random.normal(kg, (C,), jnp.float32),
            "bn_beta": 0.1 * jax.random.normal(kbe, (C,), jnp.float32),
            "bn_mean": 0.1 * jax.random.normal(km, (C,), jnp.float32),
            "bn_var": 1.0 + 0.1 * jax.random.uniform(kv, (C,), jnp.float32),
        }

    # upsample=False : Conv2d(4, 4, 3, stride=1, padding=1) + BN + ReLU
    p_conv = make_params(keys[1:7], 3)
    out_conv = conv_batchnorm_block(x, p_conv, kernel_size=3, stride=1,
                                    padding=1, upsample=False)
    ref_conv = conv_batchnorm_block_ref(x, p_conv, kernel_size=3, stride=1,
                                        padding=1, upsample=False)

    # upsample=True : ConvTranspose2d(4, 4, 3, stride=2, padding=1, output_padding=1)
    p_up = make_params(keys[7:13], 3)
    out_up = conv_batchnorm_block(x, p_up, kernel_size=3, stride=2,
                                  padding=1, upsample=True)
    ref_up = conv_batchnorm_block_ref(x, p_up, kernel_size=3, stride=2,
                                      padding=1, upsample=True)

    out_conv, out_up, ref_conv, ref_up = jax.block_until_ready(
        (out_conv, out_up, ref_conv, ref_up))

    assert out_conv.shape == (N, C, H, W), out_conv.shape
    assert out_up.shape == (N, C, 2 * H, 2 * W), out_up.shape
    for o in (out_conv, out_up):
        assert bool(jnp.all(jnp.isfinite(o)))
        assert bool(jnp.all(o >= 0.0))              # fused ReLU
    assert float(jnp.max(jnp.abs(out_conv - ref_conv))) < 2e-2
    assert float(jnp.max(jnp.abs(out_up - ref_up))) < 2e-2
    print("KERNEL_OK")
</pallas_src>

<mosaic_0001>
module attributes {stable_mosaic.version = 11 : i64} {
  func.func @_matmul_bias_relu_kernel(%arg0: i32, %arg1: i32, %arg2: memref<1x36x256xf32, #tpu.memory_space<vmem>>, %arg3: memref<4x36xf32, #tpu.memory_space<vmem>>, %arg4: memref<4x1xf32, #tpu.memory_space<vmem>>, %arg5: memref<1x4x256xf32, #tpu.memory_space<vmem>>) attributes {dimension_semantics = [#tpu.dimension_semantics<parallel>, #tpu.dimension_semantics<parallel>], iteration_bounds = array<i64: 2, 1>, scalar_prefetch = 0 : i64, scratch_operands = 0 : i64, tpu.core_type = #tpu.core_type<tc>, window_params = [{transform_indices = @transform_0, window_bounds = array<i64: 1, 36, 256>}, {pipeline_mode = #tpu.pipeline_mode<synchronous>, transform_indices = @transform_1, window_bounds = array<i64: 4, 36>}, {pipeline_mode = #tpu.pipeline_mode<synchronous>, transform_indices = @transform_2, window_bounds = array<i64: 4, 1>}, {transform_indices = @transform_3, window_bounds = array<i64: 1, 4, 256>}]} {
    %c0 = arith.constant 0 : index
    %c0_0 = arith.constant 0 : index
    %0 = vector.load %arg3[%c0, %c0_0] : memref<4x36xf32, #tpu.memory_space<vmem>>, vector<4x36xf32>
    %c0_1 = arith.constant 0 : index
    %c0_2 = arith.constant 0 : index
    %c0_3 = arith.constant 0 : index
    %1 = vector.load %arg2[%c0_1, %c0_2, %c0_3] : memref<1x36x256xf32, #tpu.memory_space<vmem>>, vector<1x36x256xf32>
    %2 = vector.shape_cast %1 : vector<1x36x256xf32> to vector<36x256xf32>
    %cst = arith.constant dense<0.000000e+00> : vector<4x256xf32>
    %3 = tpu.matmul %0, %2, %cst {dimension_numbers = #tpu.dot_dimension_numbers<[1], [0], [0], [1], [0, 0, 1, 1], [], []>} : vector<4x36xf32>, vector<36x256xf32>, vector<4x256xf32> -> vector<4x256xf32>
    %c0_4 = arith.constant 0 : index
    %c0_5 = arith.constant 0 : index
    %4 = vector.load %arg4[%c0_4, %c0_5] : memref<4x1xf32, #tpu.memory_space<vmem>>, vector<4x1xf32>
    %5 = vector.broadcast %4 : vector<4x1xf32> to vector<4x256xf32>
    %6 = arith.addf %3, %5 : vector<4x256xf32>
    %cst_6 = arith.constant 0.000000e+00 : f32
    %7 = vector.broadcast %cst_6 : f32 to vector<4x256xf32>
    %8 = arith.maximumf %6, %7 : vector<4x256xf32>
    %c0_7 = arith.constant 0 : index
    %c0_8 = arith.constant 0 : index
    %c0_9 = arith.constant 0 : index
    %9 = vector.load %arg5[%c0_7, %c0_8, %c0_9] : memref<1x4x256xf32, #tpu.memory_space<vmem>>, vector<1x4x256xf32>
    %10 = vector.shape_cast %9 : vector<1x4x256xf32> to vector<4x256xf32>
    %11 = vector.shape_cast %8 : vector<4x256xf32> to vector<1x4x256xf32>
    tpu.vector_store %arg5[%c0_7, %c0_8, %c0_9], %11 {strides = array<i32>} : memref<1x4x256xf32, #tpu.memory_space<vmem>>, vector<1x4x256xf32>,
    return
  }
  func.func @transform_0(%arg0: i32, %arg1: i32) -> (i32, i32, i32) {
    %c0_i32 = arith.constant 0 : i32
    %c0_i32_0 = arith.constant 0 : i32
    return %arg0, %c0_i32, %arg1 : i32, i32, i32
  }
  func.func @transform_1(%arg0: i32, %arg1: i32) -> (i32, i32) {
    %c0_i32 = arith.constant 0 : i32
    %c0_i32_0 = arith.constant 0 : i32
    %c0_i32_1 = arith.constant 0 : i32
    return %c0_i32, %c0_i32_0 : i32, i32
  }
  func.func @transform_2(%arg0: i32, %arg1: i32) -> (i32, i32) {
    %c0_i32 = arith.constant 0 : i32
    %c0_i32_0 = arith.constant 0 : i32
    %c0_i32_1 = arith.constant 0 : i32
    return %c0_i32, %c0_i32_0 : i32, i32
  }
  func.func @transform_3(%arg0: i32, %arg1: i32) -> (i32, i32, i32) {
    %c0_i32 = arith.constant 0 : i32
    %c0_i32_0 = arith.constant 0 : i32
    return %arg0, %c0_i32, %arg1 : i32, i32, i32
  }
}

</mosaic_0001>

<bundles_post_ra>
// kernel: tpu_custom_call.1
= control target key start
LH: loop header
LB: loop body
LE: loop exit
PB: predicated region body
PF: predicated region fallthrough
CT: control target
= control target key end

     0   :  { %8 = vsyncpa [#allocation3], 0  ;;  %s680_s0 = inlined_call_operand.vmem [shape: f32[2,36,256], index: 0, kind: input, shape index: {}]   ;;  %s681_s1 = inlined_call_operand.vmem [shape: f32[4,36], index: 1, kind: input, shape index: {}]   ;;  %s682_s2 = inlined_call_operand.vmem [shape: f32[4,1], index: 2, kind: input, shape index: {}]   ;;  %s683_s3 = inlined_call_operand.hbm [shape: f32[2,4,256], index: 3, kind: output, shape index: {}]  }
   0x1   :  { %10 = vsyncpa [#allocation3 + $0x1], 0  ;;  %s575_s12 = smov 0   ;;  %s577_s13 = smov 0  }
   0x2   :  { %s579_s14 = smov 0   ;;  %s581_s15 = smov 0  }
   0x3   :  { %s583_s16 = smov 0   ;;  %s585_s17 = smov 0  }
   0x4 LB: > { %s399_s18 = sadd.s32 4294967295, %s550_s17   ;;  %s400_s19 = sadd.s32 4294967294, %s550_s17   ;;  %s550_s17 = sphi %s585_s17, %s16_s17   ;;  %s546_s16 = sphi %s583_s16, %s690_s16   ;;  %s542_s15 = sphi %s581_s15, %s689_s15   ;;  %s538_s14 = sphi %s579_s14, %s688_s14   ;;  %s534_s13 = sphi %s577_s13, %s687_s13   ;;  %s530_s12 = sphi %s575_s12, %s686_s12  }
   0x5   : > { %s28_s20 = sadd.s32 1, %s546_s16  ;;  %s107_s21 = sadd.s32 1, %s538_s14 }
   0x6   : > { %p30_p0 = scmp.ge.s32.totalorder %s28_s20, 2  ;;  %p117_p1 = scmp.ne.s32.totalorder %s538_s14, %s534_s13 }
   0x7   : > { %p118_p2 = scmp.eq.s32.totalorder %s399_s18, 1  ;;  %p123_p3 = scmp.ne.s32.totalorder %s534_s13, %s530_s12 }
   0x8   : > { %s692_s20 = smov (%p30_p0, %s28_s20), 0  ;;  %p124_p5 = scmp.eq.s32.totalorder %s400_s19, 1 }
   0x9   : > { %p615_p4 = por %p118_p2, %p117_p1  ;;  %s102_s23 = ssub.s32 %s546_s16, %s692_s20 }
   0xa   : > { %p403_p6 = scmp.ge.s32.totalorder %s550_s17, 1  ;;  %p105_p7 = scmp.eq.s32.totalorder %s102_s23, 0 }
   0xb   : > { %p622_p8 = por %p124_p5, %p123_p3  ;;  %p161_p9 = scmp.lt.s32.totalorder %s550_s17, 3 }
   0xc   : > { %s628_s25 = scalar_select %p105_p7, %s538_s14, %s107_s21  }
   0xd   : > { %p162_p10 = pnand %p403_p6, %p161_p9 }
   0xe   : > { %p190_p11 = scmp.lt.s32.totalorder (!%p162_p10), %s542_s15, 1  ;;  %s186_s8 = sand.u32 (!%p162_p10), 1, %s534_s13  }
   0xf   : > { %165 = sbr.rel (%p162_p10) target bundleno = 250 (0xfa), region = 32  ;;  %s404_s9 = sshll.u32 (!%p162_p10), %s186_s8, 3 }
  0x10   : > { %s414_s10 = sshll.u32 (!%p162_p10), %s542_s15, 7  ;;  %s188_s11 = scalar_lea.vmem (!%p162_p10), [#allocation2], %s404_s9 }
  0x11   : > { %s323_s18 = sshll.u32 (!%p162_p10), %s188_s11, 4  ;;  %s321_s23 = scalar_lea.hbm (!%p162_p10), %s683_s3, %s414_s10  ;;  %s324_s18 = int_to_ptr.vmem [resolvable:$true] %s323_s18 }
  0x12   : > { %s307_s26 = scalar_lea.sflag (!%p162_p10), [#allocation3], %s186_s8  ;;  %s474_s27 = scalar_lea.vmem (!%p162_p10), %s324_s18, 128 }
  0x13   : > { %p475_p12 = scmp.ne.s32.totalorder (!%p162_p10), %s324_s18, %s474_s27 }
  0x14   : > { %v552_v0 = vmov 0.0   ;;  %v211_v1 = vld [vmem:[%s682_s2] sm:$0xf]  ;;  %s191_s28 = scalar_select %p190_p11, %s542_s15, 1  ;;  %v553_v2 = vmov 0   ;;  %vm221_vm0 = vcmask 1043456  }
  0x15   : > { %292 = vmatprep.mubr.f32.mxu0 %v552_v0  ;;  %473 = vset.pattern.permute.xlu0 %v553_v2  ;;  %v200_v13 = vld [vmem:[%s681_s1] sm:$0xf]  ;;  %vm217_vm1 = vcmask 293888   ;;  %p476_p13 = pnand %p475_p12, %p615_p4 }
  0x16   : > { %214 = vperm.xlu0 %473, %v211_v1   ;;  %s415_s29 = smul.u32 80, %s191_s28  ;;  %s554_s28 = smov [#allocation2]  }
  0x17   : > { %p477_p0 = pneg %p476_p13 }
  0x18   : > { %s197_s5 = scalar_lea.vmem %s680_s0, %s415_s29  ;;  %s478_s29 = sshll.u32 %s554_s28, 4  ;;  %s479_s29 = int_to_ptr.vmem [resolvable:$false] %s478_s29 }
  0x19   : > { %v210_v3 = vld [vmem:[%s197_s5 + $0x48] sm:$0xf]  ;;  %v209_v4 = vld [vmem:[%s197_s5 + $0x40] sm:$0xf]  ;;  %v208_v5 = vld [vmem:[%s197_s5 + $0x38] sm:$0xff]  ;;  %s480_s15 = scalar_lea.vmem %s479_s29, 256  ;;  %p481_p1 = scmp.lt.s32.totalorder %s324_s18, %s479_s29 }
  0x1a   : > { %406 = vmatprep.subr.msk.mxu0 %vm221_vm0, %v210_v3  ;;  %v207_v6 = vld [vmem:[%s197_s5 + $0x30] sm:$0xff]  ;;  %v206_v7 = vld [vmem:[%s197_s5 + $0x28] sm:$0xff]  ;;  %v205_v8 = vld [vmem:[%s197_s5 + $0x20] sm:$0xff]  ;;  %p482_p2 = scmp.lt.s32.totalorder %s480_s15, %s474_s27 }
  0x1b   : > { %407 = vmatpush1.msk.msra.mxu0 %vm221_vm0, %v209_v4  ;;  %v204_v9 = vld [vmem:[%s197_s5 + $0x18] sm:$0xff]  ;;  %v203_v10 = vld [vmem:[%s197_s5 + $0x10] sm:$0xff]  ;;  %v202_v11 = vld [vmem:[%s197_s5 + $0x8] sm:$0xff] }
  0x1c   : > { %252 = vmatprep.subr.mxu0 %v208_v5  ;;  %v201_v12 = vld [vmem:[%s197_s5] sm:$0xff]  ;;  %p483_p3 = por %p482_p2, %p481_p1 }
  0x1d   : > { %253 = vmatpush1.msra.mxu0 %v207_v6 }
  0x1e   : > { %254 = vmatprep.subr.mxu0 %v206_v7  ;;  %p484_p5 = pnand %p483_p3, %p477_p0 }
  0x1f   : > { %255 = vmatpush1.msra.mxu0 %v205_v8 }
  0x20   : > { %256 = vmatprep.subr.mxu0 %v204_v9 }
  0x21   : > { %257 = vmatpush1.msra.mxu0 %v203_v10 }
  0x22   : > { %258 = vmatprep.subr.mxu0 %v202_v11 }
  0x23   : > { %259 = vmatpush1.msra.mxu0 %v201_v12 }
  0x24   : > { %408 = vmatmul.mubr.msk.f32.vlgmr.msra.gmra.mxu0 %vm217_vm1, %v200_v13 }
  0x91   : > { %v215_v14 = vpop.permute.xlu0 %214 }
  0xe4   : > { %v294_v15 = vpop.f32.mrf.mxu0 }
  0xe5   : > { %v295_v16 = vadd.f32 %v294_v15, %v215_v14 }
  0xe6   : > { %v296_v17 = vpop.f32.mrf.mxu0 }
  0xe7   : > { %v297_v18 = vadd.f32 %v296_v17, %v215_v14  ;;  %v299_v19 = vmax.f32 %v295_v16, 0.0 }
  0xe9   : > { %v300_v20 = vmax.f32 %v297_v18, 0.0 }
  0xeb   : > { %v303_v21 = vcombine.low %v299_v19, %v300_v20 }
  0xed   : > { %305 = vst [vmem:[%s188_s11] sm:$0xff] %v303_v21 }
  0xee   : > { %487 = shalt.err (!%p484_p5)
}
  0xef   : > { %s488_s30 = scalar_lea.hbm %s321_s23, 128  ;;  %s492_s6 = scalar_lea.hbm %s683_s3, 256 }
  0xf0   : > { %p489_p6 = scmp.ne.s32.totalorder %s321_s23, %s488_s30  ;;  %p493_p10 = scmp.lt.s32.totalorder %s321_s23, %s683_s3 }
  0xf1   : > { %p494_p11 = scmp.lt.s32.totalorder %s492_s6, %s488_s30 }
  0xf2   : > { %p490_p7 = pnand %p489_p6, %p615_p4 }
  0xf3   : > { %p495_p12 = por %p494_p11, %p493_p10 }
  0xf4   : > { %p491_p9 = pneg %p490_p7 }
  0xf6   : > { %p496_p13 = pnand %p495_p12, %p491_p9 }
  0xf8   : > { %499 = shalt.err (!%p496_p13)
}
  0xf9   : > { %416 = dma.vmem_to_hbm [thread:$0]  (%p615_p4), %s324_s18, 128, %s321_s23, %s307_s26  }
  0xfa PF: > { %p422_p0 = scmp.ge.s32.totalorder %s550_s17, 2  ;;  %s335_s9 = sand.u32 1, %s530_s12  }
  0xfb   : > { %s336_s10 = scalar_lea.sflag [#allocation3], %s335_s9 }
  0xfc   : > { %p419_p1 = pnand %p422_p0, %p622_p8 }
  0xfe   : > { %p420_p2 = pneg %p419_p1 }
 0x100   : > { %525 = dma.done.wait (%p420_p2), %s336_s10, 128  }
 0x101   : > { %527 = vsyncadd (%p420_p2), %s336_s10, 4294967168  ;;  %s16_s17 = sadd.s32 1, %s550_s17   ;;  %s686_s12 = smov %s534_s13 }
 0x102   : > { %p13_p3 = scmp.ge.s32.totalorder %s16_s17, 4   ;;  %s687_s13 = smov %s538_s14 }
 0x103   : > { %s688_s14 = smov %s628_s25  ;;  %s689_s15 = smov %s546_s16 }
 0x104   : > { %s690_s16 = smov %s692_s20  ;;  %15 = sbr.rel (!%p13_p3) target bundleno = 4 (0x4), region = 67 }
 0x109   :  { %341 = vsyncpa [#allocation3], 1 }
 0x10a   :  { %343 = vsyncpa [#allocation3 + $0x1], 1 }

</bundles_post_ra>
